<compile_context>
chip_gen: v6e
topology: v6e:2x2x1
jax: 0.10.0
libtpu: 0.0.40
codegen_flags: <defaults>
</compile_context>

<pallas_src>
import jax
import jax.numpy as jnp
from jax.experimental import pallas as pl
from jax.experimental.pallas import tpu as pltpu


def _make_outconv_kernel(cin: int, cout: int):
    """Builds a kernel with the (tiny, static) channel loops fully unrolled."""

    def kernel(w_ref, b_ref, x_ref, o_ref):
        # w_ref : SMEM (cout, cin)   scalar weights
        # b_ref : SMEM (cout,)       scalar bias
        # x_ref : VMEM (1, cin,  ts) -- lane axis = spatial (dense)
        # o_ref : VMEM (1, cout, ts) -- lane axis = spatial (dense)
        # Load each input channel row once, upcast to f32 for VPU math.
        xs = [x_ref[:, ci:ci + 1, :].astype(jnp.float32) for ci in range(cin)]
        for co in range(cout):
            acc = xs[0] * w_ref[co, 0] + b_ref[co]
            for ci in range(1, cin):
                acc = acc + xs[ci] * w_ref[co, ci]
            o_ref[:, co:co + 1, :] = acc.astype(o_ref.dtype)

    return kernel


def _pick_spatial_tile(s: int, max_ts: int = 2048) -> int:
    """Largest lane-dense spatial tile (<= max_ts) for an H*W extent of `s`."""
    if s <= max_ts:
        return s                      # full-dim block: always layout-legal
    for ts in range(max_ts, 127, -128):
        if s % ts == 0:               # prefer a tile that divides evenly
            return ts
    return max_ts                     # ragged edge block is masked by Pallas


def outconv_1x1(x_nchw, weight, bias, *, max_spatial_tile: int = 2048):
    """1x1 conv with PyTorch nn.Conv2d(kernel_size=1) semantics.

    x_nchw : (N, Cin, H, W)
    weight : (Cout, Cin, 1, 1)
    bias   : (Cout,)
    returns: (N, Cout, H, W)
    """
    n, cin, h, w = x_nchw.shape
    cout = weight.shape[0]
    s = h * w

    # Free reshape (merges contiguous trailing dims): no transpose, no pad copy.
    x_flat = x_nchw.reshape(n, cin, s)
    w_mat = weight.reshape(cout, cin).astype(jnp.float32)   # scalars -> SMEM
    b_vec = bias.reshape(cout).astype(jnp.float32)          # scalars -> SMEM

    ts = _pick_spatial_tile(s, max_spatial_tile)
    grid = (n, pl.cdiv(s, ts))

    itemsize = jnp.dtype(x_nchw.dtype).itemsize
    cost = pl.CostEstimate(
        flops=2 * n * s * cin * cout,
        transcendentals=0,
        bytes_accessed=n * s * (cin + cout) * itemsize + (cout * cin + cout) * 4,
    )

    out_flat = pl.pallas_call(
        _make_outconv_kernel(cin, cout),
        out_shape=jax.ShapeDtypeStruct((n, cout, s), x_nchw.dtype),
        grid=grid,
        in_specs=[
            pl.BlockSpec(memory_space=pltpu.MemorySpace.SMEM),       # weight
            pl.BlockSpec(memory_space=pltpu.MemorySpace.SMEM),       # bias
            pl.BlockSpec((1, cin, ts), lambda ni, si: (ni, 0, si)),  # x tile
        ],
        out_specs=pl.BlockSpec((1, cout, ts), lambda ni, si: (ni, 0, si)),
        compiler_params=pltpu.CompilerParams(
            dimension_semantics=("parallel", "parallel"),
        ),
        cost_estimate=cost,
    )(w_mat, b_vec, x_flat)

    return out_flat.reshape(n, cout, h, w)


def init_outconv_params(key, in_channels, out_channels, dtype=jnp.float32):
    """Deterministic init matching nn.Conv2d default (kaiming-uniform-ish bounds)."""
    kw, kb = jax.random.split(key)
    fan_in = in_channels * 1 * 1
    bound = 1.0 / jnp.sqrt(fan_in)
    weight = jax.random.uniform(
        kw, (out_channels, in_channels, 1, 1), dtype, minval=-bound, maxval=bound
    )
    bias = jax.random.uniform(kb, (out_channels,), dtype, minval=-bound, maxval=bound)
    return weight, bias


if __name__ == "__main__":
    key = jax.random.PRNGKey(0)
    k_x, k_p = jax.random.split(key)

    N, Cin, H, W = 2, 4, 16, 16
    Cout = 3

    x = jax.random.normal(k_x, (N, Cin, H, W), dtype=jnp.float32)
    weight, bias = init_outconv_params(k_p, Cin, Cout)

    out = jax.block_until_ready(outconv_1x1(x, weight, bias))

    # Reference check against plain-JAX 1x1 conv (einsum over channels).
    ref = jnp.einsum("nchw,oc->nohw", x, weight.reshape(Cout, Cin)) \
        + bias[None, :, None, None]
    assert out.shape == (N, Cout, H, W)
    assert jnp.allclose(out, ref, atol=1e-5, rtol=1e-5)

    print("KERNEL_OK")
</pallas_src>

<mosaic_0001>
module attributes {stable_mosaic.version = 11 : i64} {
  func.func @kernel(%arg0: i32, %arg1: i32, %arg2: memref<3x4xf32, #tpu.memory_space<smem>>, %arg3: memref<3xf32, #tpu.memory_space<smem>>, %arg4: memref<1x4x256xf32, #tpu.memory_space<vmem>>, %arg5: memref<1x3x256xf32, #tpu.memory_space<vmem>>) attributes {dimension_semantics = [#tpu.dimension_semantics<parallel>, #tpu.dimension_semantics<parallel>], iteration_bounds = array<i64: 2, 1>, scalar_prefetch = 0 : i64, scratch_operands = 0 : i64, tpu.core_type = #tpu.core_type<tc>, window_params = [{transform_indices = @transform_0, window_bounds = array<i64: 3, 4>}, {transform_indices = @transform_1, window_bounds = array<i64: 3>}, {transform_indices = @transform_2, window_bounds = array<i64: 1, 4, 256>}, {transform_indices = @transform_3, window_bounds = array<i64: 1, 3, 256>}]} {
    %c0 = arith.constant 0 : index
    %c0_0 = arith.constant 0 : index
    %c0_1 = arith.constant 0 : index
    %0 = vector.load %arg4[%c0, %c0_0, %c0_1] : memref<1x4x256xf32, #tpu.memory_space<vmem>>, vector<1x1x256xf32>
    %c0_2 = arith.constant 0 : index
    %c1 = arith.constant 1 : index
    %c0_3 = arith.constant 0 : index
    %1 = vector.load %arg4[%c0_2, %c1, %c0_3] : memref<1x4x256xf32, #tpu.memory_space<vmem>>, vector<1x1x256xf32>
    %c0_4 = arith.constant 0 : index
    %c2 = arith.constant 2 : index
    %c0_5 = arith.constant 0 : index
    %2 = vector.load %arg4[%c0_4, %c2, %c0_5] : memref<1x4x256xf32, #tpu.memory_space<vmem>>, vector<1x1x256xf32>
    %c0_6 = arith.constant 0 : index
    %c3 = arith.constant 3 : index
    %c0_7 = arith.constant 0 : index
    %3 = vector.load %arg4[%c0_6, %c3, %c0_7] : memref<1x4x256xf32, #tpu.memory_space<vmem>>, vector<1x1x256xf32>
    %c0_8 = arith.constant 0 : index
    %c0_9 = arith.constant 0 : index
    %4 = memref.load %arg2[%c0_8, %c0_9] : memref<3x4xf32, #tpu.memory_space<smem>>
    %5 = vector.broadcast %4 : f32 to vector<1x1x256xf32>
    %6 = arith.mulf %0, %5 : vector<1x1x256xf32>
    %c0_10 = arith.constant 0 : index
    %7 = memref.load %arg3[%c0_10] : memref<3xf32, #tpu.memory_space<smem>>
    %8 = vector.broadcast %7 : f32 to vector<1x1x256xf32>
    %9 = arith.addf %6, %8 : vector<1x1x256xf32>
    %c0_11 = arith.constant 0 : index
    %c1_12 = arith.constant 1 : index
    %10 = memref.load %arg2[%c0_11, %c1_12] : memref<3x4xf32, #tpu.memory_space<smem>>
    %11 = vector.broadcast %10 : f32 to vector<1x1x256xf32>
    %12 = arith.mulf %1, %11 : vector<1x1x256xf32>
    %13 = arith.addf %9, %12 : vector<1x1x256xf32>
    %c0_13 = arith.constant 0 : index
    %c2_14 = arith.constant 2 : index
    %14 = memref.load %arg2[%c0_13, %c2_14] : memref<3x4xf32, #tpu.memory_space<smem>>
    %15 = vector.broadcast %14 : f32 to vector<1x1x256xf32>
    %16 = arith.mulf %2, %15 : vector<1x1x256xf32>
    %17 = arith.addf %13, %16 : vector<1x1x256xf32>
    %c0_15 = arith.constant 0 : index
    %c3_16 = arith.constant 3 : index
    %18 = memref.load %arg2[%c0_15, %c3_16] : memref<3x4xf32, #tpu.memory_space<smem>>
    %19 = vector.broadcast %18 : f32 to vector<1x1x256xf32>
    %20 = arith.mulf %3, %19 : vector<1x1x256xf32>
    %21 = arith.addf %17, %20 : vector<1x1x256xf32>
    %c0_17 = arith.constant 0 : index
    %c0_18 = arith.constant 0 : index
    %c0_19 = arith.constant 0 : index
    %22 = vector.load %arg5[%c0_17, %c0_18, %c0_19] : memref<1x3x256xf32, #tpu.memory_space<vmem>>, vector<1x1x256xf32>
    tpu.vector_store %arg5[%c0_17, %c0_18, %c0_19], %21 {strides = array<i32>} : memref<1x3x256xf32, #tpu.memory_space<vmem>>, vector<1x1x256xf32>,
    %c1_20 = arith.constant 1 : index
    %c0_21 = arith.constant 0 : index
    %23 = memref.load %arg2[%c1_20, %c0_21] : memref<3x4xf32, #tpu.memory_space<smem>>
    %24 = vector.broadcast %23 : f32 to vector<1x1x256xf32>
    %25 = arith.mulf %0, %24 : vector<1x1x256xf32>
    %c1_22 = arith.constant 1 : index
    %26 = memref.load %arg3[%c1_22] : memref<3xf32, #tpu.memory_space<smem>>
    %27 = vector.broadcast %26 : f32 to vector<1x1x256xf32>
    %28 = arith.addf %25, %27 : vector<1x1x256xf32>
    %c1_23 = arith.constant 1 : index
    %c1_24 = arith.constant 1 : index
    %29 = memref.load %arg2[%c1_23, %c1_24] : memref<3x4xf32, #tpu.memory_space<smem>>
    %30 = vector.broadcast %29 : f32 to vector<1x1x256xf32>
    %31 = arith.mulf %1, %30 : vector<1x1x256xf32>
    %32 = arith.addf %28, %31 : vector<1x1x256xf32>
    %c1_25 = arith.constant 1 : index
    %c2_26 = arith.constant 2 : index
    %33 = memref.load %arg2[%c1_25, %c2_26] : memref<3x4xf32, #tpu.memory_space<smem>>
    %34 = vector.broadcast %33 : f32 to vector<1x1x256xf32>
    %35 = arith.mulf %2, %34 : vector<1x1x256xf32>
    %36 = arith.addf %32, %35 : vector<1x1x256xf32>
    %c1_27 = arith.constant 1 : index
    %c3_28 = arith.constant 3 : index
    %37 = memref.load %arg2[%c1_27, %c3_28] : memref<3x4xf32, #tpu.memory_space<smem>>
    %38 = vector.broadcast %37 : f32 to vector<1x1x256xf32>
    %39 = arith.mulf %3, %38 : vector<1x1x256xf32>
    %40 = arith.addf %36, %39 : vector<1x1x256xf32>
    %c0_29 = arith.constant 0 : index
    %c1_30 = arith.constant 1 : index
    %c0_31 = arith.constant 0 : index
    %41 = vector.load %arg5[%c0_29, %c1_30, %c0_31] : memref<1x3x256xf32, #tpu.memory_space<vmem>>, vector<1x1x256xf32>
    tpu.vector_store %arg5[%c0_29, %c1_30, %c0_31], %40 {strides = array<i32>} : memref<1x3x256xf32, #tpu.memory_space<vmem>>, vector<1x1x256xf32>,
    %c2_32 = arith.constant 2 : index
    %c0_33 = arith.constant 0 : index
    %42 = memref.load %arg2[%c2_32, %c0_33] : memref<3x4xf32, #tpu.memory_space<smem>>
    %43 = vector.broadcast %42 : f32 to vector<1x1x256xf32>
    %44 = arith.mulf %0, %43 : vector<1x1x256xf32>
    %c2_34 = arith.constant 2 : index
    %45 = memref.load %arg3[%c2_34] : memref<3xf32, #tpu.memory_space<smem>>
    %46 = vector.broadcast %45 : f32 to vector<1x1x256xf32>
    %47 = arith.addf %44, %46 : vector<1x1x256xf32>
    %c2_35 = arith.constant 2 : index
    %c1_36 = arith.constant 1 : index
    %48 = memref.load %arg2[%c2_35, %c1_36] : memref<3x4xf32, #tpu.memory_space<smem>>
    %49 = vector.broadcast %48 : f32 to vector<1x1x256xf32>
    %50 = arith.mulf %1, %49 : vector<1x1x256xf32>
    %51 = arith.addf %47, %50 : vector<1x1x256xf32>
    %c2_37 = arith.constant 2 : index
    %c2_38 = arith.constant 2 : index
    %52 = memref.load %arg2[%c2_37, %c2_38] : memref<3x4xf32, #tpu.memory_space<smem>>
    %53 = vector.broadcast %52 : f32 to vector<1x1x256xf32>
    %54 = arith.mulf %2, %53 : vector<1x1x256xf32>
    %55 = arith.addf %51, %54 : vector<1x1x256xf32>
    %c2_39 = arith.constant 2 : index
    %c3_40 = arith.constant 3 : index
    %56 = memref.load %arg2[%c2_39, %c3_40] : memref<3x4xf32, #tpu.memory_space<smem>>
    %57 = vector.broadcast %56 : f32 to vector<1x1x256xf32>
    %58 = arith.mulf %3, %57 : vector<1x1x256xf32>
    %59 = arith.addf %55, %58 : vector<1x1x256xf32>
    %c0_41 = arith.constant 0 : index
    %c2_42 = arith.constant 2 : index
    %c0_43 = arith.constant 0 : index
    %60 = vector.load %arg5[%c0_41, %c2_42, %c0_43] : memref<1x3x256xf32, #tpu.memory_space<vmem>>, vector<1x1x256xf32>
    tpu.vector_store %arg5[%c0_41, %c2_42, %c0_43], %59 {strides = array<i32>} : memref<1x3x256xf32, #tpu.memory_space<vmem>>, vector<1x1x256xf32>,
    return
  }
  func.func @transform_0(%arg0: i32, %arg1: i32) -> (i32, i32) {
    %c0_i32 = arith.constant 0 : i32
    %c0_i32_0 = arith.constant 0 : i32
    %c0_i32_1 = arith.constant 0 : i32
    return %c0_i32, %c0_i32_0 : i32, i32
  }
  func.func @transform_1(%arg0: i32, %arg1: i32) -> i32 {
    %c0_i32 = arith.constant 0 : i32
    %c0_i32_0 = arith.constant 0 : i32
    return %c0_i32 : i32
  }
  func.func @transform_2(%arg0: i32, %arg1: i32) -> (i32, i32, i32) {
    %c0_i32 = arith.constant 0 : i32
    %c0_i32_0 = arith.constant 0 : i32
    return %arg0, %c0_i32, %arg1 : i32, i32, i32
  }
  func.func @transform_3(%arg0: i32, %arg1: i32) -> (i32, i32, i32) {
    %c0_i32 = arith.constant 0 : i32
    %c0_i32_0 = arith.constant 0 : i32
    return %arg0, %c0_i32, %arg1 : i32, i32, i32
  }
}

</mosaic_0001>

<bundles_post_ra>
// kernel: tpu_custom_call.1
= control target key start
LH: loop header
LB: loop body
LE: loop exit
PB: predicated region body
PF: predicated region fallthrough
CT: control target
= control target key end

     0   :  { %8 = vsyncpa [#allocation4], 0  ;;  %s830_s0 = inlined_call_operand.hbm [shape: f32[3,4], index: 0, kind: input, shape index: {}]   ;;  %s831_s1 = inlined_call_operand.vmem [shape: f32[3], index: 1, kind: input, shape index: {}]   ;;  %s832_s2 = inlined_call_operand.hbm [shape: f32[2,4,256], index: 2, kind: input, shape index: {}]   ;;  %s833_s3 = inlined_call_operand.vmem [shape: f32[2,3,256], index: 3, kind: output, shape index: {}]  }
   0x1   :  { %9 = vsyncpa [#allocation5], 0 }
   0x2   :  { %10 = vsyncpa [#allocation3], 0 }
   0x3   :  { %12 = vsyncpa [#allocation3 + $0x1], 0  ;;  %s681_s12 = smov 0   ;;  %s683_s13 = smov 0  }
   0x4   :  { %s685_s14 = smov 0   ;;  %s687_s15 = smov 0  }
   0x5   :  { %s689_s16 = smov 0   ;;  %s691_s17 = smov 0  }
   0x6 LB: > { %s431_s18 = sadd.s32 4294967295, %s656_s17   ;;  %p94_p0 = scmp.ne.s32.totalorder %s640_s13, %s636_s12  ;;  %s656_s17 = sphi %s691_s17, %s18_s17   ;;  %s652_s16 = sphi %s689_s16, %s846_s16   ;;  %s648_s15 = sphi %s687_s15, %s845_s15   ;;  %s644_s14 = sphi %s685_s14, %s844_s14   ;;  %s640_s13 = sphi %s683_s13, %s843_s13   ;;  %s636_s12 = sphi %s681_s12, %s842_s12  }
   0x7   : > { %p711_p1 = scmp.eq.s32.totalorder %s431_s18, 0  ;;  %p433_p2 = scmp.ge.s32.totalorder %s656_s17, 1 }
   0x8   : > { %p133_p3 = scmp.lt.s32.totalorder %s656_s17, 3  ;;  %s155_s24 = sshll.u32 %s831_s1, 4  ;;  %s156_s24 = int_to_ptr.vmem [resolvable:$true] %s155_s24 }
   0x9   : > { %p719_p4 = por %p711_p1, %p94_p0  ;;  %s30_s26 = sadd.s32 1, %s652_s16 }
   0xa   : > { %p723_p5 = pnand %p433_p2, %p133_p3  ;;  %p739_p8 = scmp.ge.s32.totalorder %s30_s26, 2 }
   0xb   : > { %s658_s28 = smov [#allocation2]   ;;  %s555_s4 = scalar_lea.vmem %s156_s24, 16 }
   0xc   : > { %p478_p6 = pneg %p723_p5  ;;  %p556_p9 = scmp.ne.s32.totalorder %s156_s24, %s555_s4 }
   0xd   : > { %p563_p13 = scmp.lt.s32.totalorder %s156_s24, %s156_s24  ;;  %p564_p0 = scmp.lt.s32.totalorder %s555_s4, %s555_s4 }
   0xe   : > { %p734_p7 = pnand %p478_p6, %p711_p1 }
   0xf   : > { %p565_p2 = por %p564_p0, %p563_p13 }
  0x10   : > { %481 = dma.hbm_to_smem (!%p734_p7), %s830_s0, 64, %s658_s28, [#allocation4]  }
  0x11   : > { %p557_p10 = pneg %p734_p7 }
  0x13   : > { %p558_p11 = pnand %p557_p10, %p556_p9 }
  0x15   : > { %p559_p12 = pneg %p558_p11 }
  0x17   : > { %p566_p3 = pnand %p565_p2, %p559_p12 }
  0x19   : > { %569 = shalt.err (!%p566_p3)
}
  0x1a   : > { %s659_s5 = smov [#allocation6]   ;;  %s848_s26 = smov (%p739_p8, %s30_s26), 0 }
  0x1b   : > { %484 = dma.vmem_to_smem (!%p734_p7), %s156_s24, 16, %s659_s5, [#allocation5]  }
  0x1c   : > { %s81_s6 = sadd.s32 1, %s644_s14  ;;  %p88_p6 = scmp.ne.s32.totalorder %s644_s14, %s640_s13 }
  0x1d   : > { %s76_s7 = ssub.s32 %s652_s16, %s848_s26  ;;  %p89_p9 = scmp.eq.s32.totalorder %s656_s17, 0 }
  0x1e   : > { %p79_p10 = scmp.eq.s32.totalorder %s76_s7, 0  ;;  %p491_p11 = scmp.lt.s32.totalorder %s656_s17, 2 }
  0x1f   : > { %p90_p12 = por %p89_p9, %p88_p6  ;;  %s166_s8 = sand.u32 1, %s644_s14  }
  0x20   : > { %s765_s9 = scalar_select %p79_p10, %s644_s14, %s81_s6  }
  0x21   : > { %s437_s10 = sshll.u32 %s166_s8, 3  ;;  %s466_s11 = sshll.u32 %s652_s16, 7 }
  0x22   : > { %s178_s22 = scalar_lea.hbm %s832_s2, %s466_s11  ;;  %s170_s23 = scalar_lea.vmem [#allocation7], %s437_s10 }
  0x23   : > { %s180_s24 = sshll.u32 %s170_s23, 4  ;;  %p771_p7 = pnand %p491_p11, %p90_p12  ;;  %s181_s24 = int_to_ptr.vmem [resolvable:$true] %s180_s24 }
  0x24   : > { %s167_s27 = scalar_lea.sflag [#allocation3], %s166_s8  ;;  %s583_s28 = scalar_lea.vmem %s181_s24, 128 }
  0x25   : > { %p572_p8 = pneg %p771_p7  ;;  %p584_p13 = scmp.ne.s32.totalorder %s181_s24, %s583_s28 }
  0x26   : > { %s660_s29 = smov [#allocation7]  }
  0x27   : > { %p586_p0 = pnand %p584_p13, %p572_p8  ;;  %s588_s30 = sshll.u32 %s660_s29, 4  ;;  %s589_s30 = int_to_ptr.vmem [resolvable:$false] %s588_s30 }
  0x28   : > { %s590_s4 = scalar_lea.vmem %s589_s30, 256  ;;  %p591_p3 = scmp.lt.s32.totalorder %s181_s24, %s589_s30 }
  0x29   : > { %p587_p2 = pneg %p586_p0  ;;  %p592_p6 = scmp.lt.s32.totalorder %s590_s4, %s583_s28 }
  0x2b   : > { %p593_p9 = por %p592_p6, %p591_p3 }
  0x2d   : > { %p594_p10 = pnand %p593_p9, %p587_p2 }
  0x2f   : > { %597 = shalt.err (!%p594_p10)
}
  0x30   : > { %488 = dma.hbm_to_vmem [thread:$0]  (!%p771_p7), %s178_s22, 128, %s181_s24, %s167_s27  }
  0x31   : > { %189 = sbr.rel (%p723_p5) target bundleno = 91 (0x5b), region = 32 }
  0x36   : > { %623 = dma.done.wait (%p711_p1), [#allocation4], 64  }
  0x37   : > { %625 = vsyncadd (%p711_p1), [#allocation4], 4294967232 }
  0x38   : > { %627 = dma.done.wait (%p711_p1), [#allocation5], 16  }
  0x39   : > { %629 = vsyncadd (%p711_p1), [#allocation5], 4294967280  ;;  %s199_s5 = sand.u32 1, %s640_s13  }
  0x3a   : > { %s443_s6 = sshll.u32 %s199_s5, 3  ;;  %s200_s7 = scalar_lea.sflag [#allocation3], %s199_s5 }
  0x3b   : > { %s203_s8 = scalar_lea.vmem [#allocation7], %s443_s6 }
  0x3c   : > { %631 = dma.done.wait (%p719_p4), %s200_s7, 128  }
  0x3d   : > { %633 = vsyncadd (%p719_p4), %s200_s7, 4294967168 }
  0x3e   : > { %208 = sfence }
  0x3f   : > { %p233_p5 = scmp.lt.s32.totalorder %s648_s15, 1  ;;  %s249_s21 = sld [smem:[#allocation2]]  ;;  %v242_v0 = vld [vmem:[%s203_s8] ss:$4 sm:$0x3]  ;;  %v267_v13 = vlaneseq }
  0x40   : > { %s252_s19 = sld [smem:[#allocation6]]  ;;  %v446_v3 = vld [vmem:[%s203_s8 + $0x1] ss:$4 sm:$0x3] }
  0x41   : > { %s850_s15 = smov (!%p233_p5, %s648_s15), 1  ;;  %s449_s10 = sld [smem:[#allocation2 + $0x1]]  ;;  %v447_v4 = vld [vmem:[%s203_s8 + $0x2] ss:$4 sm:$0x3]  ;;  %vm802_vm0 = vcmp.lt.s32.totalorder %v267_v13, 256 }
  0x42   : > { %s450_s11 = sld [smem:[#allocation2 + $0x2]]  ;;  %v448_v6 = vld [vmem:[%s203_s8 + $0x3] ss:$4 sm:$0x3]  ;;  %s467_s27 = sshll.u32 %s850_s15, 3 }
  0x43   : > { %s451_s12 = sld [smem:[#allocation2 + $0x3]]  ;;  %s240_s6 = scalar_lea.vmem %s833_s3, %s467_s27 }
  0x44   : > { %s452_s18 = sld [smem:[#allocation2 + $0x80]] }
  0x45   : > { %v250_v1 = vstv %s249_s21  ;;  %s453_s22 = sld [smem:[#allocation6 + $0x1]] }
  0x46   : > { %v251_v2 = vmul.f32 %v250_v1, %v242_v0  ;;  %v253_v5 = vstv %s252_s19  ;;  %s454_s20 = sld [smem:[#allocation2 + $0x81]] }
  0x47   : > { %v256_v8 = vstv %s449_s10  ;;  %s455_s23 = sld [smem:[#allocation2 + $0x82]] }
  0x48   : > { %v254_v7 = vadd.f32 %v253_v5, %v251_v2  ;;  %v257_v9 = vmul.f32 %v446_v3, %v256_v8  ;;  %v260_v10 = vstv %s450_s11  ;;  %s456_s24 = sld [smem:[#allocation2 + $0x83]] }
  0x49   : > { %v261_v11 = vmul.f32 %v447_v4, %v260_v10  ;;  %v264_v12 = vstv %s451_s12  ;;  %s458_s25 = sld [smem:[#allocation2 + $0x100]] }
  0x4a   : > { %v258_v14 = vadd.f32 %v257_v9, %v254_v7  ;;  %v265_v15 = vmul.f32 %v448_v6, %v264_v12  ;;  %v273_v16 = vstv %s452_s18  ;;  %s459_s28 = sld [smem:[#allocation6 + $0x2]] }
  0x4b   : > { %v274_v17 = vmul.f32 %v273_v16, %v242_v0  ;;  %v276_v18 = vstv %s453_s22  ;;  %s460_s29 = sld [smem:[#allocation2 + $0x101]] }
  0x4c   : > { %v262_v19 = vadd.f32 %v261_v11, %v258_v14  ;;  %v279_v20 = vstv %s454_s20  ;;  %s461_s30 = sld [smem:[#allocation2 + $0x102]] }
  0x4d   : > { %v277_v22 = vadd.f32 %v276_v18, %v274_v17  ;;  %v280_v23 = vmul.f32 %v446_v3, %v279_v20  ;;  %v283_v24 = vstv %s455_s23  ;;  %s462_s15 = sld [smem:[#allocation2 + $0x103]] }
  0x4e   : > { %v266_v25 = vadd.f32 %v265_v15, %v262_v19  ;;  %v284_v26 = vmul.f32 %v447_v4, %v283_v24  ;;  %v287_v27 = vstv %s456_s24 }
  0x4f   : > { %v281_v28 = vadd.f32 %v280_v23, %v277_v22  ;;  %v288_v29 = vmul.f32 %v448_v6, %v287_v27  ;;  %v293_v30 = vstv %s458_s25 }
  0x50   : > { %271 = vst.msk [vmem:[%s240_s6] ss:$4 sm:$0x3] %vm802_vm0, %v266_v25  ;;  %v294_v31 = vmul.f32 %v293_v30, %v242_v0  ;;  %v296_v32 = vstv %s459_s28 }
  0x51   : > { %v285_v33 = vadd.f32 %v284_v26, %v281_v28  ;;  %v299_v34 = vstv %s460_s29 }
  0x52   : > { %v297_v35 = vadd.f32 %v296_v32, %v294_v31  ;;  %v300_v36 = vmul.f32 %v446_v3, %v299_v34  ;;  %v303_v37 = vstv %s461_s30 }
  0x53   : > { %v289_v38 = vadd.f32 %v288_v29, %v285_v33  ;;  %v304_v39 = vmul.f32 %v447_v4, %v303_v37  ;;  %v307_v40 = vstv %s462_s15 }
  0x54   : > { %v301_v41 = vadd.f32 %v300_v36, %v297_v35  ;;  %v308_v42 = vmul.f32 %v448_v6, %v307_v40 }
  0x55   : > { %457 = vst.msk [vmem:[%s240_s6 + $0x1] ss:$4 sm:$0x3] %vm802_vm0, %v289_v38 }
  0x56   : > { %v305_v43 = vadd.f32 %v304_v39, %v301_v41 }
  0x58   : > { %v309_v44 = vadd.f32 %v308_v42, %v305_v43 }
  0x5a   : > { %463 = vst.msk [vmem:[%s240_s6 + $0x2] ss:$4 sm:$0x3] %vm802_vm0, %v309_v44 }
  0x5b PF: > { %s18_s17 = sadd.s32 1, %s656_s17   ;;  %s842_s12 = smov %s640_s13 }
  0x5c   : > { %p15_p1 = scmp.ge.s32.totalorder %s18_s17, 4   ;;  %s843_s13 = smov %s644_s14 }
  0x5d   : > { %s844_s14 = smov %s765_s9  ;;  %s845_s15 = smov %s652_s16 }
  0x5e   : > { %s846_s16 = smov %s848_s26  ;;  %17 = sbr.rel (!%p15_p1) target bundleno = 6 (0x6), region = 87 }
  0x63   :  { %342 = vsyncpa [#allocation3], 1 }
  0x64   :  { %344 = vsyncpa [#allocation3 + $0x1], 1 }
  0x65   :  { %345 = vsyncpa [#allocation4], 1 }
  0x66   :  { %347 = vsyncpa [#allocation4 + $0x1], 1 }
  0x67   :  { %348 = vsyncpa [#allocation5], 1 }
  0x68   :  { %350 = vsyncpa [#allocation5 + $0x1], 1 }

</bundles_post_ra>
